<compile_context>
chip_gen: v6e
topology: v6e:2x2x1
jax: 0.10.0
libtpu: 0.0.40
codegen_flags: <defaults>
</compile_context>

<pallas_src>
import jax
import jax.numpy as jnp
from jax.experimental import pallas as pl
from jax.experimental.pallas import tpu as pltpu


def _focus_conv_kernel(w_ref, b_ref, x_ref, o_ref):
    """Fused 1x1-conv + folded-BN bias + hardswish on one spatial tile.

    w_ref: (Cout, K)   BN-scale-folded 1x1 conv weight (constant over the grid)
    b_ref: (Cout, 1)   folded BN bias (broadcast over lanes)
    x_ref: (K, TN)     space-to-depth activations, channels on sublanes, spatial on lanes
    o_ref: (Cout, TN)  output tile, already in flattened-NCHW layout
    """
    y = jnp.dot(w_ref[...], x_ref[...], preferred_element_type=jnp.float32)
    y = y + b_ref[...]
    # Hardswish: y * clamp(y + 3, 0, 6) / 6
    o_ref[...] = (y * jnp.clip(y + 3.0, 0.0, 6.0) * (1.0 / 6.0)).astype(o_ref.dtype)


def _pick_spatial_tile(msp, target):
    """Pick the lane (spatial) tile: full extent if small, else a big multiple of 128."""
    if msp <= target:
        return msp                     # block == full dim: always legal
    t = (target // 128) * 128
    while t >= 128:
        if msp % t == 0:               # prefer an exact divisor (no partial last block)
            return t
        t -= 128
    return (target // 128) * 128       # partial last block; Pallas masks OOB writeback


def focus_forward(x_nchw, weight, bn_gamma, bn_beta, bn_mean, bn_var,
                  eps=1e-5, spatial_tile=2048, matmul_dtype=None):
    """Focus forward pass. NCHW in, NCHW out.

    x_nchw : (B, C, H, W) float32
    weight : (Cout, 4*C)  -- 1x1 conv weight with input channels flattened
    matmul_dtype : e.g. jnp.bfloat16 on v6e/v7x to halve HBM read traffic (f32 epilogue kept).
    """
    B, C, H, W = x_nchw.shape
    assert H % 2 == 0 and W % 2 == 0
    H2, W2 = H // 2, W // 2
    Cout, K = weight.shape
    assert K == 4 * C
    Msp = H2 * W2

    # ---- space-to-depth as a single reshape + transpose (channel order TL, BL, TR, BR) ----
    # x[b, c, 2*h2+dh, 2*w2+dw] maps to s2d channel index (2*dw + dh)*C + c.
    x6 = x_nchw.reshape(B, C, H2, 2, W2, 2)                      # (b, c, h2, dh, w2, dw)
    x_s2d = jnp.transpose(x6, (0, 5, 3, 1, 2, 4)).reshape(B, K, Msp)   # (B, 4C, H2*W2)

    # ---- fold eval-mode BatchNorm into the weight and a per-channel bias ----
    scale = bn_gamma / jnp.sqrt(bn_var + eps)                    # (Cout,)
    w_eff = (weight * scale[:, None]).astype(jnp.float32)        # (Cout, K)
    bias = (bn_beta - bn_mean * scale).reshape(Cout, 1).astype(jnp.float32)

    if matmul_dtype is not None:                                 # bf16 lever for v6e/v7x
        x_s2d = x_s2d.astype(matmul_dtype)
        w_eff = w_eff.astype(matmul_dtype)

    tn = _pick_spatial_tile(Msp, spatial_tile)
    n_sp = pl.cdiv(Msp, tn)
    grid = (B, n_sp)                   # spatial tiles innermost -> contiguous HBM streaming

    cost = pl.CostEstimate(
        flops=2 * B * Msp * K * Cout,
        transcendentals=0,
        bytes_accessed=int(x_s2d.size * x_s2d.dtype.itemsize
                           + w_eff.size * w_eff.dtype.itemsize
                           + B * Cout * Msp * 4),
    )

    out = pl.pallas_call(
        _focus_conv_kernel,
        out_shape=jax.ShapeDtypeStruct((B, Cout, Msp), jnp.float32),
        grid_spec=pltpu.PrefetchScalarGridSpec(
            num_scalar_prefetch=0,
            grid=grid,
            in_specs=[
                pl.BlockSpec((Cout, K), lambda b, j: (0, 0)),        # weight: resident
                pl.BlockSpec((Cout, 1), lambda b, j: (0, 0)),        # bias:   resident
                pl.BlockSpec((None, K, tn), lambda b, j: (b, 0, j)),  # activations
            ],
            out_specs=pl.BlockSpec((None, Cout, tn), lambda b, j: (b, 0, j)),
        ),
        compiler_params=pltpu.CompilerParams(
            dimension_semantics=("parallel", "parallel")),
        cost_estimate=cost,
    )(w_eff, bias, x_s2d)

    # (B, Cout, H2*W2) is already flattened NCHW: a free reshape, no transpose.
    return out.reshape(B, Cout, H2, W2)


def _reference(x_nchw, weight, gamma, beta, mean, var, eps=1e-5):
    tl = x_nchw[..., ::2, ::2]
    tr = x_nchw[..., ::2, 1::2]
    bl = x_nchw[..., 1::2, ::2]
    br = x_nchw[..., 1::2, 1::2]
    x = jnp.concatenate((tl, bl, tr, br), axis=1)                # (B, 4C, H2, W2)
    y = jnp.einsum("bchw,oc->bohw", x, weight,
                   precision=jax.lax.Precision.HIGHEST)
    s = gamma / jnp.sqrt(var + eps)
    b = beta - mean * s
    y = y * s[None, :, None, None] + b[None, :, None, None]
    return y * jnp.clip(y + 3.0, 0.0, 6.0) / 6.0


if __name__ == "__main__":
    key = jax.random.PRNGKey(0)
    B, C, H, W = 2, 4, 16, 16
    Cout = 8

    k1, k2, k3, k4, k5, k6 = jax.random.split(key, 6)
    x = jax.random.normal(k1, (B, C, H, W), dtype=jnp.float32)
    weight = 0.1 * jax.random.normal(k2, (Cout, 4 * C), dtype=jnp.float32)  # 1x1 conv weight
    bn_gamma = 1.0 + 0.1 * jax.random.normal(k3, (Cout,), dtype=jnp.float32)
    bn_beta = 0.1 * jax.random.normal(k4, (Cout,), dtype=jnp.float32)
    bn_mean = 0.1 * jax.random.normal(k5, (Cout,), dtype=jnp.float32)
    bn_var = jnp.abs(jax.random.normal(k6, (Cout,), dtype=jnp.float32)) + 0.5

    out = focus_forward(x, weight, bn_gamma, bn_beta, bn_mean, bn_var)
    out = jax.block_until_ready(out)

    ref = _reference(x, weight, bn_gamma, bn_beta, bn_mean, bn_var)
    assert out.shape == (B, Cout, H // 2, W // 2)
    assert jnp.allclose(out, ref, atol=1e-5, rtol=1e-5)
    print("KERNEL_OK")
</pallas_src>

<mosaic_0001>
module attributes {stable_mosaic.version = 11 : i64} {
  func.func @_focus_conv_kernel(%arg0: i32, %arg1: i32, %arg2: memref<8x16xf32, #tpu.memory_space<vmem>>, %arg3: memref<8x1xf32, #tpu.memory_space<vmem>>, %arg4: memref<1x16x64xf32, #tpu.memory_space<vmem>>, %arg5: memref<1x8x64xf32, #tpu.memory_space<vmem>>) attributes {dimension_semantics = [#tpu.dimension_semantics<parallel>, #tpu.dimension_semantics<parallel>], iteration_bounds = array<i64: 2, 1>, scalar_prefetch = 0 : i64, scratch_operands = 0 : i64, tpu.core_type = #tpu.core_type<tc>, window_params = [{pipeline_mode = #tpu.pipeline_mode<synchronous>, transform_indices = @transform_0, window_bounds = array<i64: 8, 16>}, {pipeline_mode = #tpu.pipeline_mode<synchronous>, transform_indices = @transform_1, window_bounds = array<i64: 8, 1>}, {transform_indices = @transform_2, window_bounds = array<i64: 1, 16, 64>}, {transform_indices = @transform_3, window_bounds = array<i64: 1, 8, 64>}]} {
    %c0 = arith.constant 0 : index
    %c0_0 = arith.constant 0 : index
    %0 = vector.load %arg2[%c0, %c0_0] : memref<8x16xf32, #tpu.memory_space<vmem>>, vector<8x16xf32>
    %c0_1 = arith.constant 0 : index
    %c0_2 = arith.constant 0 : index
    %c0_3 = arith.constant 0 : index
    %1 = vector.load %arg4[%c0_1, %c0_2, %c0_3] : memref<1x16x64xf32, #tpu.memory_space<vmem>>, vector<1x16x64xf32>
    %2 = vector.shape_cast %1 : vector<1x16x64xf32> to vector<16x64xf32>
    %cst = arith.constant dense<0.000000e+00> : vector<8x64xf32>
    %3 = tpu.matmul %0, %2, %cst {dimension_numbers = #tpu.dot_dimension_numbers<[1], [0], [0], [1], [0, 0, 1, 1], [], []>} : vector<8x16xf32>, vector<16x64xf32>, vector<8x64xf32> -> vector<8x64xf32>
    %c0_4 = arith.constant 0 : index
    %c0_5 = arith.constant 0 : index
    %4 = vector.load %arg3[%c0_4, %c0_5] : memref<8x1xf32, #tpu.memory_space<vmem>>, vector<8x1xf32>
    %5 = vector.broadcast %4 : vector<8x1xf32> to vector<8x64xf32>
    %6 = arith.addf %3, %5 : vector<8x64xf32>
    %cst_6 = arith.constant 3.000000e+00 : f32
    %7 = vector.broadcast %cst_6 : f32 to vector<8x64xf32>
    %8 = arith.addf %6, %7 : vector<8x64xf32>
    %cst_7 = arith.constant 0.000000e+00 : f32
    %cst_8 = arith.constant 6.000000e+00 : f32
    %9 = vector.broadcast %cst_7 : f32 to vector<8x64xf32>
    %10 = arith.maximumf %9, %8 : vector<8x64xf32>
    %11 = vector.broadcast %cst_8 : f32 to vector<8x64xf32>
    %12 = arith.minimumf %11, %10 : vector<8x64xf32>
    %13 = arith.mulf %6, %12 : vector<8x64xf32>
    %cst_9 = arith.constant 0.166666672 : f32
    %14 = vector.broadcast %cst_9 : f32 to vector<8x64xf32>
    %15 = arith.mulf %13, %14 : vector<8x64xf32>
    %c0_10 = arith.constant 0 : index
    %c0_11 = arith.constant 0 : index
    %c0_12 = arith.constant 0 : index
    %16 = vector.load %arg5[%c0_10, %c0_11, %c0_12] : memref<1x8x64xf32, #tpu.memory_space<vmem>>, vector<1x8x64xf32>
    %17 = vector.shape_cast %16 : vector<1x8x64xf32> to vector<8x64xf32>
    %18 = vector.shape_cast %15 : vector<8x64xf32> to vector<1x8x64xf32>
    tpu.vector_store %arg5[%c0_10, %c0_11, %c0_12], %18 {strides = array<i32>} : memref<1x8x64xf32, #tpu.memory_space<vmem>>, vector<1x8x64xf32>,
    return
  }
  func.func @transform_0(%arg0: i32, %arg1: i32) -> (i32, i32) {
    %c0_i32 = arith.constant 0 : i32
    %c0_i32_0 = arith.constant 0 : i32
    %c0_i32_1 = arith.constant 0 : i32
    return %c0_i32, %c0_i32_0 : i32, i32
  }
  func.func @transform_1(%arg0: i32, %arg1: i32) -> (i32, i32) {
    %c0_i32 = arith.constant 0 : i32
    %c0_i32_0 = arith.constant 0 : i32
    %c0_i32_1 = arith.constant 0 : i32
    return %c0_i32, %c0_i32_0 : i32, i32
  }
  func.func @transform_2(%arg0: i32, %arg1: i32) -> (i32, i32, i32) {
    %c0_i32 = arith.constant 0 : i32
    %c0_i32_0 = arith.constant 0 : i32
    return %arg0, %c0_i32, %arg1 : i32, i32, i32
  }
  func.func @transform_3(%arg0: i32, %arg1: i32) -> (i32, i32, i32) {
    %c0_i32 = arith.constant 0 : i32
    %c0_i32_0 = arith.constant 0 : i32
    return %arg0, %c0_i32, %arg1 : i32, i32, i32
  }
}

</mosaic_0001>

<bundles_post_ra>
// kernel: tpu_custom_call.1
= control target key start
LH: loop header
LB: loop body
LE: loop exit
PB: predicated region body
PF: predicated region fallthrough
CT: control target
= control target key end

     0   :  { %8 = vsyncpa [#allocation3], 0  ;;  %s762_s0 = inlined_call_operand.vmem [shape: f32[8,16], index: 0, kind: input, shape index: {}]   ;;  %s763_s1 = inlined_call_operand.vmem [shape: f32[8,1], index: 1, kind: input, shape index: {}]   ;;  %s764_s2 = inlined_call_operand.hbm [shape: f32[2,16,64], index: 2, kind: input, shape index: {}]   ;;  %s765_s3 = inlined_call_operand.hbm [shape: f32[2,8,64], index: 3, kind: output, shape index: {}]  }
   0x1   :  { %10 = vsyncpa [#allocation3 + $0x1], 0 }
   0x2   :  { %11 = vsyncpa [#allocation4], 0 }
   0x3   :  { %13 = vsyncpa [#allocation4 + $0x1], 0  ;;  %s623_s12 = smov 0   ;;  %s625_s13 = smov 0  }
   0x4   :  { %s627_s14 = smov 0   ;;  %s629_s15 = smov 0  }
   0x5   :  { %s631_s16 = smov 0   ;;  %s633_s17 = smov 0  }
   0x6 LB: > { %s392_s18 = sadd.s32 4294967295, %s594_s17   ;;  %s393_s19 = sadd.s32 4294967294, %s594_s17   ;;  %s594_s17 = sphi %s633_s17, %s19_s17   ;;  %s590_s16 = sphi %s631_s16, %s776_s16   ;;  %s586_s15 = sphi %s629_s15, %s775_s15   ;;  %s582_s14 = sphi %s627_s14, %s774_s14   ;;  %s578_s13 = sphi %s625_s13, %s773_s13   ;;  %s574_s12 = sphi %s623_s12, %s772_s12  }
   0x7   : > { %s31_s20 = sadd.s32 1, %s590_s16  ;;  %s82_s21 = sadd.s32 1, %s582_s14 }
   0x8   : > { %p33_p0 = scmp.ge.s32.totalorder %s31_s20, 2  ;;  %p89_p1 = scmp.ne.s32.totalorder %s582_s14, %s578_s13 }
   0x9   : > { %p90_p2 = scmp.eq.s32.totalorder %s594_s17, 0  ;;  %p95_p3 = scmp.ne.s32.totalorder %s578_s13, %s574_s12 }
   0xa   : > { %s778_s20 = smov (%p33_p0, %s31_s20), 0  ;;  %p96_p5 = scmp.eq.s32.totalorder %s392_s18, 0 }
   0xb   : > { %p664_p4 = por %p90_p2, %p89_p1  ;;  %s77_s23 = ssub.s32 %s590_s16, %s778_s20 }
   0xc   : > { %p121_p6 = scmp.eq.s32.totalorder %s392_s18, 1  ;;  %p80_p7 = scmp.eq.s32.totalorder %s77_s23, 0 }
   0xd   : > { %p670_p8 = por %p96_p5, %p95_p3  ;;  %p127_p10 = scmp.eq.s32.totalorder %s393_s19, 1 }
   0xe   : > { %p674_p9 = por %p121_p6, %p89_p1  ;;  %p430_p13 = scmp.lt.s32.totalorder %s594_s17, 2 }
   0xf   : > { %s679_s26 = scalar_select %p80_p7, %s582_s14, %s82_s21  }
  0x10   : > { %p681_p11 = por %p127_p10, %p95_p3  ;;  %s153_s28 = sand.u32 1, %s582_s14  }
  0x11   : > { %s396_s29 = sshll.u32 %s153_s28, 4  ;;  %s407_s30 = sshll.u32 %s590_s16, 8 }
  0x12   : > { %s164_s6 = scalar_lea.hbm %s764_s2, %s407_s30  ;;  %s157_s7 = scalar_lea.vmem [#allocation2], %s396_s29 }
  0x13   : > { %s165_s8 = sshll.u32 %s157_s7, 4  ;;  %p694_p0 = pnand %p430_p13, %p664_p4  ;;  %s166_s8 = int_to_ptr.vmem [resolvable:$true] %s165_s8 }
  0x14   : > { %p399_p1 = scmp.ge.s32.totalorder %s594_s17, 1  ;;  %s154_s10 = scalar_lea.sflag [#allocation3], %s153_s28 }
  0x15   : > { %p488_p2 = pneg %p694_p0  ;;  %s499_s11 = scalar_lea.vmem %s166_s8, 256 }
  0x16   : > { %p500_p3 = scmp.ne.s32.totalorder %s166_s8, %s499_s11  ;;  %s596_s18 = smov [#allocation2]  }
  0x17   : > { %s504_s19 = sshll.u32 %s596_s18, 4  ;;  %s505_s19 = int_to_ptr.vmem [resolvable:$false] %s504_s19 }
  0x18   : > { %p502_p5 = pnand %p500_p3, %p488_p2  ;;  %s506_s21 = scalar_lea.vmem %s505_s19, 512 }
  0x19   : > { %p507_p7 = scmp.lt.s32.totalorder %s166_s8, %s505_s19  ;;  %p508_p10 = scmp.lt.s32.totalorder %s506_s21, %s499_s11 }
  0x1a   : > { %p503_p6 = pneg %p502_p5 }
  0x1b   : > { %p509_p12 = por %p508_p10, %p507_p7 }
  0x1d   : > { %p510_p4 = pnand %p509_p12, %p503_p6 }
  0x1f   : > { %513 = shalt.err (!%p510_p4)
}
  0x20   : > { %s597_s22 = smov 128   ;;  %s598_s23 = smov 8  }
  0x21   : > { %425 = dma.hbm_to_vmem [thread:$0]  (!%p694_p0), %s164_s6, 256, %s166_s8, %s154_s10, %s597_s22, %s597_s22, %s598_s23  }
  0x22   : > { %p173_p13 = scmp.lt.s32.totalorder %s594_s17, 3 }
  0x24   : > { %p174_p2 = pnand %p399_p1, %p173_p13 }
  0x25   : > { %s707_s28 = sand.u32 (!%p174_p2), 1, %s578_s13  }
  0x26   : > { %177 = sbr.rel (%p174_p2) target bundleno = 267 (0x10b), region = 32  ;;  %s400_s29 = sshll.u32 (!%p174_p2), %s707_s28, 4 }
  0x27   : > { %s180_s30 = scalar_lea.sflag (!%p174_p2), [#allocation3], %s707_s28  ;;  %s183_s4 = scalar_lea.vmem (!%p174_p2), [#allocation2], %s400_s29 }
  0x2b   : > { %565 = dma.done.wait (%p670_p8), %s180_s30, 256  }
  0x2c   : > { %567 = vsyncadd (%p670_p8), %s180_s30, 4294967040  ;;  %v599_v0 = vmov 0.0   ;;  %vm600_vm0 = vmmov 0   ;;  %v601_v1 = vmov 0   ;;  %v208_v2 = vld [vmem:[%s183_s4 + $0x8] sm:$0xff]  ;;  %v207_v3 = vld [vmem:[%s183_s4] sm:$0xff] }
  0x2d   : > { %411 = vmatprep.subr.mxu0 %v599_v0  ;;  %415 = vmatprep.mubr.msk.f32.mxu0 %vm600_vm0, %v599_v0  ;;  %v206_v4 = vld [vmem:[%s762_s0] sm:$0xff]  ;;  %vm215_vm1 = vcmask 130048   ;;  %s401_s24 = sshll.u32 %s707_s28, 3  ;;  %s404_s9 = sshll.u32 %s586_s15, 7  ;;  %vm294_vm2 = vcmask 523264  }
  0x2e   : > { %485 = vset.pattern.permute.xlu0 %v601_v1  ;;  %412 = vmatpush3.msra.mxu0 %v208_v2  ;;  %v209_v5 = vld [vmem:[%s763_s1] sm:$0xff]  ;;  %s205_s10 = scalar_lea.vmem [#allocation5], %s401_s24  ;;  %s309_s21 = scalar_lea.hbm %s765_s3, %s404_s9 }
  0x2f   : > { %413 = vmatprep.subr.mxu0 %v599_v0  ;;  %212 = vperm.xlu0 %485, %v209_v5   ;;  %s311_s11 = sshll.u32 %s205_s10, 4  ;;  %s297_s22 = scalar_lea.sflag [#allocation4], %s707_s28  ;;  %s312_s11 = int_to_ptr.vmem [resolvable:$true] %s311_s11 }
  0x30   : > { %414 = vmatpush3.msra.mxu0 %v207_v3  ;;  %s514_s23 = scalar_lea.vmem %s312_s11, 128  ;;  %s602_s29 = smov [#allocation5]  }
  0x31   : > { %416 = vmatmul.mubr.msk.f32.vlgmr.msra.gmra.mxu0 %vm215_vm1, %v206_v4  ;;  %p515_p8 = scmp.ne.s32.totalorder %s312_s11, %s514_s23  ;;  %s518_s30 = sshll.u32 %s602_s29, 4  ;;  %s519_s30 = int_to_ptr.vmem [resolvable:$false] %s518_s30 }
  0x32   : > { %s520_s15 = scalar_lea.vmem %s519_s30, 256  ;;  %p521_p1 = scmp.lt.s32.totalorder %s312_s11, %s519_s30 }
  0x33   : > { %p516_p12 = pnand %p515_p8, %p674_p9  ;;  %p522_p3 = scmp.lt.s32.totalorder %s520_s15, %s514_s23 }
  0x35   : > { %p517_p0 = pneg %p516_p12  ;;  %p523_p5 = por %p522_p3, %p521_p1 }
  0x37   : > { %p524_p6 = pnand %p523_p5, %p517_p0 }
  0xaa   : > { %v213_v6 = vpop.permute.xlu0 %212 }
  0xf1   : > { %v285_v7 = vpop.f32.mrf.mxu0 }
  0xf2   : > { %v286_v8 = vadd.f32 %v285_v7, %v213_v6 }
  0xf3   : > { %v417_v9 = vpop.f32.mrf.mxu0 }
  0xf4   : > { %v289_v10 = vadd.f32 3.0, %v286_v8 }
  0xf6   : > { %v290_v11 = vmax.f32 %v289_v10, 0.0 }
  0xf8   : > { %v291_v12 = vmin.f32 %v290_v11, 6.0 }
  0xfa   : > { %v292_v13 = vmul.f32 %v291_v12, %v286_v8 }
  0xfc   : > { %v293_v14 = vmul.f32 0.16666667, %v292_v13 }
  0xfe   : > { %295 = vst.msk [vmem:[%s205_s10] sm:$0xff] %vm294_vm2, %v293_v14 }
  0xff   : > { %527 = shalt.err (!%p524_p6)
}
 0x100   : > { %s528_s4 = scalar_lea.hbm %s309_s21, 128  ;;  %s532_s6 = scalar_lea.hbm %s765_s3, 256 }
 0x101   : > { %p529_p7 = scmp.ne.s32.totalorder %s309_s21, %s528_s4  ;;  %p533_p13 = scmp.lt.s32.totalorder %s309_s21, %s765_s3 }
 0x102   : > { %p534_p2 = scmp.lt.s32.totalorder %s532_s6, %s528_s4 }
 0x103   : > { %p530_p10 = pnand %p529_p7, %p674_p9 }
 0x104   : > { %p535_p8 = por %p534_p2, %p533_p13 }
 0x105   : > { %p531_p4 = pneg %p530_p10 }
 0x107   : > { %p536_p12 = pnand %p535_p8, %p531_p4 }
 0x109   : > { %539 = shalt.err (!%p536_p12)
}
 0x10a   : > { %420 = dma.vmem_to_hbm [thread:$0]  (%p674_p9), %s312_s11, 128, %s309_s21, %s297_s22  }
 0x10b PF: > { %s323_s24 = sand.u32 1, %s574_s12   ;;  %p771_p0 = scmp.ge.s32.totalorder %s594_s17, 2 }
 0x10c   : > { %s324_s9 = scalar_lea.sflag [#allocation4], %s323_s24 }
 0x10d   : > { %p427_p1 = pnand %p771_p0, %p681_p11 }
 0x10f   : > { %p428_p3 = pneg %p427_p1 }
 0x111   : > { %569 = dma.done.wait (%p428_p3), %s324_s9, 128  }
 0x112   : > { %571 = vsyncadd (%p428_p3), %s324_s9, 4294967168  ;;  %s19_s17 = sadd.s32 1, %s594_s17   ;;  %s772_s12 = smov %s578_s13 }
 0x113   : > { %p16_p5 = scmp.ge.s32.totalorder %s19_s17, 4   ;;  %s773_s13 = smov %s582_s14 }
 0x114   : > { %s774_s14 = smov %s679_s26  ;;  %s775_s15 = smov %s590_s16 }
 0x115   : > { %s776_s16 = smov %s778_s20  ;;  %18 = sbr.rel (!%p16_p5) target bundleno = 6 (0x6), region = 77 }
 0x11a   :  { %329 = vsyncpa [#allocation3], 1 }
 0x11b   :  { %331 = vsyncpa [#allocation3 + $0x1], 1 }
 0x11c   :  { %332 = vsyncpa [#allocation4], 1 }
 0x11d   :  { %334 = vsyncpa [#allocation4 + $0x1], 1 }

</bundles_post_ra>
